<compile_context>
chip_gen: v7x
topology: tpu7x:2x2x1
jax: 0.10.0
libtpu: 0.0.40
codegen_flags: <defaults>
</compile_context>

<pallas_src>
import jax
import jax.numpy as jnp
from jax import lax
from jax.experimental import pallas as pl
from jax.experimental.pallas import tpu as pltpu

_LANE = 128
_TM_MAX = 512                         # lane width of an A column block
_A_BYTES_BUDGET = 16 * 1024 * 1024    # 2 double-buffered A blocks (v7x-safe)


def _spectral_rule_kernel(a_ref, diag_ref, x_ref, wt_ref, b_ref, o_ref):
    """One tile of nodes.

    a_ref    : (N, TM)   column block of A (all rows, TM nodes)
    diag_ref : (1, TM)   diag(A) for those nodes
    x_ref    : (in, TM)  features for those nodes (native X layout)
    wt_ref   : (in, OUT_PAD)  W.T, zero-padded to 128 lanes (resident)
    b_ref    : (1, OUT_PAD)   bias, zero-padded (resident)
    o_ref    : (TM, OUT_PAD)  output rows for those nodes
    """
    # D = colsum(A + I) = colsum(A) + 1  (cross-sublane reduce; f32 accumulate)
    d = jnp.sum(a_ref[...].astype(jnp.float32), axis=0, keepdims=True) + 1.0

    # M is diagonal: M[j, j] = (A[j, j] + 1) / D[j].  Kept in lanes.
    scale = (diag_ref[...].astype(jnp.float32) + 1.0) / d        # (1, TM)

    # aggregate = M @ X.T  ==  per-node (lane-wise) scale of X.  No transpose,
    # no masked routing: scale broadcasts across the in_units sublanes.
    xs = x_ref[...].astype(jnp.float32) * scale                  # (in, TM)

    # propagate = relu(aggregate @ W.T + b).  Contract X's feature axis
    # directly (trans-A matmul) so X never needs a layout change; result is
    # (TM, OUT_PAD) — lane-dense, unmasked store.
    out = lax.dot_general(
        xs, wt_ref[...],
        dimension_numbers=(((0,), (0,)), ((), ())),
        preferred_element_type=jnp.float32)                      # (TM, OUT_PAD)
    o_ref[...] = jnp.maximum(out + b_ref[...], 0.0).astype(o_ref.dtype)


def _plan_tiles(n, block_n):
    """Pick (TM, N_padded) for streaming A as (N_padded, TM) column blocks."""
    if block_n is not None:
        if block_n != n and block_n % _LANE != 0:
            raise ValueError("block_n must be a multiple of 128 (or equal N)")
        tm = block_n
        return tm, pl.cdiv(n, tm) * tm
    if n <= _TM_MAX:
        return n, n                       # single full block, no padding
    n_pad = pl.cdiv(n, _LANE) * _LANE
    # 2 buffers * 4 B * n_pad * tm  <=  budget   (conservative if A is bf16)
    budget_cols = max(_LANE, _A_BYTES_BUDGET // (8 * n_pad))
    tm = _LANE
    for cand in (512, 384, 256, 128):
        if cand <= budget_cols and n_pad % cand == 0:
            tm = cand
            break
    return tm, n_pad


def _pad_linear(W, b, out_pad):
    out_units = W.shape[0]
    wt = jnp.pad(jnp.transpose(W).astype(jnp.float32),
                 ((0, 0), (0, out_pad - out_units)))             # (in, out_pad)
    b2 = jnp.pad(b.astype(jnp.float32).reshape(1, out_units),
                 ((0, 0), (0, out_pad - out_units)))             # (1, out_pad)
    return wt, b2


def spectral_rule(A, X, W, b, *, block_n=None):
    """Single graph.  A: (N, N); X: (in_units, N); W: (out, in); b: (out,).

    Matches torch exactly, including: no guard for D <= 0 (a degenerate
    column of A yields inf/nan just like the reference module).
    A/X may be bf16; math is done in f32.
    """
    n = A.shape[0]
    in_units = X.shape[0]
    out_units = W.shape[0]
    out_pad = pl.cdiv(out_units, _LANE) * _LANE

    tm, n_pad = _plan_tiles(n, block_n)

    # diag(A): one tiny strided gather so the kernel never builds (N,N) masks.
    diag = jnp.diagonal(A).astype(jnp.float32).reshape(1, n)

    if n_pad != n:
        pad = n_pad - n
        # Zero padding is harmless: padded cols get D=1, scale=1, X=0 -> rows
        # of relu(b) that are sliced off below; real colsums are unchanged.
        A = jnp.pad(A, ((0, pad), (0, pad)))
        X = jnp.pad(X, ((0, 0), (0, pad)))
        diag = jnp.pad(diag, ((0, 0), (0, pad)))

    wt, b2 = _pad_linear(W, b, out_pad)

    out = pl.pallas_call(
        _spectral_rule_kernel,
        out_shape=jax.ShapeDtypeStruct((n_pad, out_pad), jnp.float32),
        grid=(n_pad // tm,),
        in_specs=[
            pl.BlockSpec((n_pad, tm), lambda i: (0, i)),          # A col block
            pl.BlockSpec((1, tm), lambda i: (0, i)),              # diag(A)
            pl.BlockSpec((in_units, tm), lambda i: (0, i)),       # X col block
            pl.BlockSpec((in_units, out_pad), lambda i: (0, 0)),  # W.T resident
            pl.BlockSpec((1, out_pad), lambda i: (0, 0)),         # bias resident
        ],
        out_specs=pl.BlockSpec((tm, out_pad), lambda i: (i, 0)),
        compiler_params=pltpu.CompilerParams(
            dimension_semantics=("parallel",)),                   # dual-TC v7x
    )(A, diag, X, wt, b2)

    return out[:n, :out_units]


def spectral_rule_batched(A, X, W, b):
    """Many small graphs at once.  A: (G, N, N); X: (G, in_units, N).

    One graph per grid step on a "parallel" axis; amortizes launch/DMA
    overhead for module-sized graphs and uses both TCs on v7x.
    """
    g, n, _ = A.shape
    in_units = X.shape[1]
    out_units = W.shape[0]
    out_pad = pl.cdiv(out_units, _LANE) * _LANE

    diag = jnp.diagonal(A, axis1=1, axis2=2).astype(jnp.float32).reshape(g, 1, n)
    wt, b2 = _pad_linear(W, b, out_pad)

    out = pl.pallas_call(
        _spectral_rule_kernel,
        out_shape=jax.ShapeDtypeStruct((g, n, out_pad), jnp.float32),
        grid=(g,),
        in_specs=[
            pl.BlockSpec((None, n, n), lambda i: (i, 0, 0)),
            pl.BlockSpec((None, 1, n), lambda i: (i, 0, 0)),
            pl.BlockSpec((None, in_units, n), lambda i: (i, 0, 0)),
            pl.BlockSpec((in_units, out_pad), lambda i: (0, 0)),
            pl.BlockSpec((1, out_pad), lambda i: (0, 0)),
        ],
        out_specs=pl.BlockSpec((None, n, out_pad), lambda i: (i, 0, 0)),
        compiler_params=pltpu.CompilerParams(
            dimension_semantics=("parallel",)),
    )(A, diag, X, wt, b2)

    return out[:, :, :out_units]


def _reference(A, X, W, b):
    """Pure-JAX mirror of the torch module (elementwise `*`, D^-0.5 twice)."""
    n = A.shape[0]
    eye = jnp.eye(n, dtype=jnp.float32)
    a_hat = A + eye
    d = jnp.sum(a_hat, axis=0)
    d_inv = d ** (-0.5)
    m = jnp.diag(d_inv) * a_hat * jnp.diag(d_inv)   # elementwise, like torch `*`
    agg = jnp.dot(m, X.T, precision=lax.Precision.HIGHEST)
    lin = jnp.dot(agg, W.T, precision=lax.Precision.HIGHEST) + b
    return jnp.maximum(lin, 0.0)


if __name__ == "__main__":
    IN_UNITS, OUT_UNITS = 8, 32

    key = jax.random.PRNGKey(0)
    k_w, k_b, k_g1, k_g2, k_batch = jax.random.split(key, 5)

    # Deterministic nn.Linear-style init: U(-1/sqrt(in), 1/sqrt(in)).
    bound = 1.0 / (IN_UNITS ** 0.5)
    W = jax.random.uniform(k_w, (OUT_UNITS, IN_UNITS), dtype=jnp.float32,
                           minval=-bound, maxval=bound)
    b = jax.random.uniform(k_b, (OUT_UNITS,), dtype=jnp.float32,
                           minval=-bound, maxval=bound)

    def make_graph(k, n):
        k_a, k_x = jax.random.split(k)
        # Positive adjacency so column sums are > 0 (D^-0.5 finite), as in torch.
        a = jax.random.uniform(k_a, (n, n), dtype=jnp.float32)
        x = jax.random.normal(k_x, (IN_UNITS, n), dtype=jnp.float32)
        return a, x

    # 1) Module-sized single graph (N=16): single-block path.
    A1, X1 = make_graph(k_g1, 16)
    out1 = jax.block_until_ready(spectral_rule(A1, X1, W, b))
    ref1 = _reference(A1, X1, W, b)
    assert out1.shape == (16, OUT_UNITS) and out1.dtype == jnp.float32
    assert jnp.allclose(out1, ref1, atol=2e-5, rtol=1e-4)

    # 2) Tiled path (forced 128-wide column blocks, with padding: N=200 -> 256).
    A2, X2 = make_graph(k_g2, 200)
    out2 = jax.block_until_ready(spectral_rule(A2, X2, W, b, block_n=128))
    ref2 = _reference(A2, X2, W, b)
    assert out2.shape == (200, OUT_UNITS)
    assert jnp.allclose(out2, ref2, atol=2e-5, rtol=1e-4)

    # 3) Batched entry point: 4 tiny graphs on a "parallel" grid axis.
    graphs = [make_graph(k, 16) for k in jax.random.split(k_batch, 4)]
    A_b = jnp.stack([ga for ga, _ in graphs])
    X_b = jnp.stack([gx for _, gx in graphs])
    out_b = jax.block_until_ready(spectral_rule_batched(A_b, X_b, W, b))
    assert out_b.shape == (4, 16, OUT_UNITS)
    for gi in range(4):
        ref_g = _reference(A_b[gi], X_b[gi], W, b)
        assert jnp.allclose(out_b[gi], ref_g, atol=2e-5, rtol=1e-4)

    print("KERNEL_OK")
</pallas_src>

<mosaic_0001>
module attributes {stable_mosaic.version = 11 : i64} {
  func.func @_spectral_rule_kernel(%arg0: i32, %arg1: memref<16x16xf32, #tpu.memory_space<vmem>>, %arg2: memref<1x16xf32, #tpu.memory_space<vmem>>, %arg3: memref<8x16xf32, #tpu.memory_space<vmem>>, %arg4: memref<8x128xf32, #tpu.memory_space<vmem>>, %arg5: memref<1x128xf32, #tpu.memory_space<vmem>>, %arg6: memref<16x128xf32, #tpu.memory_space<vmem>>) attributes {dimension_semantics = [#tpu.dimension_semantics<parallel>], iteration_bounds = array<i64: 1>, scalar_prefetch = 0 : i64, scratch_operands = 0 : i64, tpu.core_type = #tpu.core_type<tc>, window_params = [{transform_indices = @transform_0, window_bounds = array<i64: 16, 16>}, {transform_indices = @transform_1, window_bounds = array<i64: 1, 16>}, {transform_indices = @transform_2, window_bounds = array<i64: 8, 16>}, {pipeline_mode = #tpu.pipeline_mode<synchronous>, transform_indices = @transform_3, window_bounds = array<i64: 8, 128>}, {pipeline_mode = #tpu.pipeline_mode<synchronous>, transform_indices = @transform_4, window_bounds = array<i64: 1, 128>}, {transform_indices = @transform_5, window_bounds = array<i64: 16, 128>}]} {
    %c0 = arith.constant 0 : index
    %c0_0 = arith.constant 0 : index
    %0 = vector.load %arg1[%c0, %c0_0] : memref<16x16xf32, #tpu.memory_space<vmem>>, vector<16x16xf32>
    %cst = arith.constant dense<0.000000e+00> : vector<16xf32>
    %1 = vector.multi_reduction <add>, %0, %cst [0] : vector<16x16xf32> to vector<16xf32>
    %2 = vector.shape_cast %1 : vector<16xf32> to vector<1x16xf32>
    %cst_1 = arith.constant 1.000000e+00 : f32
    %3 = vector.broadcast %cst_1 : f32 to vector<1x16xf32>
    %4 = arith.addf %2, %3 : vector<1x16xf32>
    %c0_2 = arith.constant 0 : index
    %c0_3 = arith.constant 0 : index
    %5 = vector.load %arg2[%c0_2, %c0_3] : memref<1x16xf32, #tpu.memory_space<vmem>>, vector<1x16xf32>
    %cst_4 = arith.constant 1.000000e+00 : f32
    %6 = vector.broadcast %cst_4 : f32 to vector<1x16xf32>
    %7 = arith.addf %5, %6 : vector<1x16xf32>
    %8 = arith.divf %7, %4 : vector<1x16xf32>
    %c0_5 = arith.constant 0 : index
    %c0_6 = arith.constant 0 : index
    %9 = vector.load %arg3[%c0_5, %c0_6] : memref<8x16xf32, #tpu.memory_space<vmem>>, vector<8x16xf32>
    %10 = vector.broadcast %8 : vector<1x16xf32> to vector<8x16xf32>
    %11 = arith.mulf %9, %10 : vector<8x16xf32>
    %c0_7 = arith.constant 0 : index
    %c0_8 = arith.constant 0 : index
    %12 = vector.load %arg4[%c0_7, %c0_8] : memref<8x128xf32, #tpu.memory_space<vmem>>, vector<8x128xf32>
    %cst_9 = arith.constant dense<0.000000e+00> : vector<16x128xf32>
    %13 = tpu.matmul %11, %12, %cst_9 {dimension_numbers = #tpu.dot_dimension_numbers<[0], [0], [1], [1], [0, 1, 1, 1], [], []>} : vector<8x16xf32>, vector<8x128xf32>, vector<16x128xf32> -> vector<16x128xf32>
    %c0_10 = arith.constant 0 : index
    %c0_11 = arith.constant 0 : index
    %14 = vector.load %arg5[%c0_10, %c0_11] : memref<1x128xf32, #tpu.memory_space<vmem>>, vector<1x128xf32>
    %15 = vector.broadcast %14 : vector<1x128xf32> to vector<16x128xf32>
    %16 = arith.addf %13, %15 : vector<16x128xf32>
    %cst_12 = arith.constant 0.000000e+00 : f32
    %17 = vector.broadcast %cst_12 : f32 to vector<16x128xf32>
    %18 = arith.maximumf %16, %17 : vector<16x128xf32>
    %c0_13 = arith.constant 0 : index
    %c0_14 = arith.constant 0 : index
    %19 = vector.load %arg6[%c0_13, %c0_14] : memref<16x128xf32, #tpu.memory_space<vmem>>, vector<16x128xf32>
    tpu.vector_store %arg6[%c0_13, %c0_14], %18 {strides = array<i32>} : memref<16x128xf32, #tpu.memory_space<vmem>>, vector<16x128xf32>,
    return
  }
  func.func @transform_0(%arg0: i32) -> (i32, i32) {
    %c0_i32 = arith.constant 0 : i32
    %c0_i32_0 = arith.constant 0 : i32
    return %c0_i32, %arg0 : i32, i32
  }
  func.func @transform_1(%arg0: i32) -> (i32, i32) {
    %c0_i32 = arith.constant 0 : i32
    %c0_i32_0 = arith.constant 0 : i32
    return %c0_i32, %arg0 : i32, i32
  }
  func.func @transform_2(%arg0: i32) -> (i32, i32) {
    %c0_i32 = arith.constant 0 : i32
    %c0_i32_0 = arith.constant 0 : i32
    return %c0_i32, %arg0 : i32, i32
  }
  func.func @transform_3(%arg0: i32) -> (i32, i32) {
    %c0_i32 = arith.constant 0 : i32
    %c0_i32_0 = arith.constant 0 : i32
    %c0_i32_1 = arith.constant 0 : i32
    return %c0_i32, %c0_i32_0 : i32, i32
  }
  func.func @transform_4(%arg0: i32) -> (i32, i32) {
    %c0_i32 = arith.constant 0 : i32
    %c0_i32_0 = arith.constant 0 : i32
    %c0_i32_1 = arith.constant 0 : i32
    return %c0_i32, %c0_i32_0 : i32, i32
  }
  func.func @transform_5(%arg0: i32) -> (i32, i32) {
    %c0_i32 = arith.constant 0 : i32
    %c0_i32_0 = arith.constant 0 : i32
    return %arg0, %c0_i32 : i32, i32
  }
}

</mosaic_0001>

<bundles_post_ra>
// kernel: tpu_custom_call.1
= control target key start
LH: loop header
LB: loop body
LE: loop exit
PB: predicated region body
PF: predicated region fallthrough
CT: control target
= control target key end

     0   :  { %10 = vsyncpa [#allocation3], 0  ;;  %s393_s0 = inlined_call_operand.hbm [shape: f32[16,16], index: 0, kind: input, shape index: {}]   ;;  %s394_s1 = inlined_call_operand.vmem [shape: f32[1,16], index: 1, kind: input, shape index: {}]   ;;  %s395_s2 = inlined_call_operand.hbm [shape: f32[8,16], index: 2, kind: input, shape index: {}]   ;;  %s396_s3 = inlined_call_operand.vmem [shape: f32[8,128], index: 3, kind: input, shape index: {}]   ;;  %s397_s4 = inlined_call_operand.vmem [shape: f32[1,128], index: 4, kind: input, shape index: {}]   ;;  %s398_s5 = inlined_call_operand.hbm [shape: f32[16,128], index: 5, kind: output, shape index: {}]  }
   0x1   :  { %11 = vsyncpa [#allocation6], 0 }
   0x2   :  { %12 = vsyncpa [#allocation4], 0  ;;  %s307_s18 = smov [#allocation2]   ;;  %s235_s22 = scalar_lea.hbm %s393_s0, 256 }
   0x3   :  { %s18_s19 = sshll.u32 %s307_s18, 4  ;;  %p236_p0 = scmp.ne.s32.totalorder %s393_s0, %s235_s22  ;;  %s19_s19 = int_to_ptr.vmem [resolvable:$true] %s18_s19 }
   0x4   :  { %p239_p1 = scmp.lt.u32.totalorder %s235_s22, %s393_s0 }
   0x6   :  { %p241_p2 = pnand %p239_p1, %p236_p0 }
   0x8   :  { %244 = shalt.err (!%p241_p2)
}
   0x9   :  { %s245_s27 = scalar_lea.vmem %s19_s19, 256  ;;  %p250_p4 = scmp.lt.s32.totalorder %s19_s19, %s19_s19 }
   0xa   :  { %p246_p3 = scmp.ne.s32.totalorder %s19_s19, %s245_s27  ;;  %p251_p5 = scmp.lt.s32.totalorder %s245_s27, %s245_s27 }
   0xc   :  { %p252_p6 = por %p251_p5, %p250_p4 }
   0xe   :  { %p253_p7 = pnand %p252_p6, %p246_p3 }
  0x10   :  { %256 = shalt.err (!%p253_p7)
}
  0x11   :  { %s308_s28 = smov 128   ;;  %s309_s29 = smov 8  }
  0x12   :  { %24 = dma.hbm_to_vmem [thread:$0]  %s393_s0, 256, %s19_s19, [#allocation3], %s308_s28, %s308_s28, %s309_s29  }
  0x13   :  { %s310_s7 = smov [#allocation5]   ;;  %s257_s11 = scalar_lea.hbm %s395_s2, 128 }
  0x14   :  { %s33_s8 = sshll.u32 %s310_s7, 4  ;;  %p258_p8 = scmp.ne.s32.totalorder %s395_s2, %s257_s11  ;;  %s34_s8 = int_to_ptr.vmem [resolvable:$true] %s33_s8 }
  0x15   :  { %p261_p9 = scmp.lt.u32.totalorder %s257_s11, %s395_s2 }
  0x17   :  { %p263_p10 = pnand %p261_p9, %p258_p8 }
  0x19   :  { %266 = shalt.err (!%p263_p10)
}
  0x1a   :  { %s267_s16 = scalar_lea.vmem %s34_s8, 128  ;;  %p272_p12 = scmp.lt.s32.totalorder %s34_s8, %s34_s8 }
  0x1b   :  { %p268_p11 = scmp.ne.s32.totalorder %s34_s8, %s267_s16  ;;  %p273_p13 = scmp.lt.s32.totalorder %s267_s16, %s267_s16 }
  0x1d   :  { %p274_p0 = por %p273_p13, %p272_p12 }
  0x1f   :  { %p275_p1 = pnand %p274_p0, %p268_p11 }
  0x21   :  { %278 = shalt.err (!%p275_p1)
}
  0x22   :  { %36 = dma.hbm_to_vmem [thread:$0]  %s395_s2, 128, %s34_s8, [#allocation6]  }
  0x23   :  { %301 = dma.done.wait [#allocation3], 256  }
  0x24   :  { %302 = vsyncadd [#allocation3], 4294967040 }
  0x25   :  { %303 = dma.done.wait [#allocation6], 128  }
  0x26   :  { %304 = vsyncadd [#allocation6], 4294967168  ;;  %vm49_vm0 = vcmask 130048   ;;  %v47_v0 = vld [vmem:[#allocation2] sm:$0xff]  ;;  %v48_v1 = vld [vmem:[#allocation2 + $0x8] sm:$0xff]  ;;  %v66_v12 = vlaneseq  ;;  %vm112_vm1 = vcmask 64512  }
  0x27   :  { %v50_v2 = vsel %vm49_vm0, %v47_v0, 0.0  ;;  %v51_v3 = vsel %vm49_vm0, %v48_v1, 0.0  ;;  %v60_v13 = vld [vmem:[%s394_s1] sm:$0x1]  ;;  %v64_v19 = vld [vmem:[#allocation5] sm:$0xff]  ;;  %s311_s22 = smov [#allocation7]  }
  0x28   :  { %v52_v4 = vadd.f32 %v51_v3, %v50_v2  ;;  %v67_v14 = vshrl.u32 %v66_v12, 7  ;;  %v61_v15 = vadd.f32 1.0, %v60_v13  ;;  %v72_v22 = vld [vmem:[%s396_s3] sm:$0xff]  ;;  %s203_s23 = sshll.u32 %s311_s22, 4  ;;  %s204_s23 = int_to_ptr.vmem [resolvable:$true] %s203_s23 }
  0x29   :  { %222 = vmatprep.subr.mxu0 %v72_v22  ;;  %v216_v25 = vld [vmem:[%s397_s4] ss:$0 sm:$0xff]  ;;  %s279_s3 = scalar_lea.vmem %s204_s23, 256  ;;  %p284_p3 = scmp.lt.s32.totalorder %s204_s23, %s204_s23 }
  0x2a   :  { %v53_v5 = vrot.slane %v52_v4, 4  ;;  %v68_v16 = vsub.s32 0, %v67_v14  ;;  %223 = vmatpush3.msra.mxu0 %v72_v22  ;;  %p280_p2 = scmp.ne.s32.totalorder %s204_s23, %s279_s3  ;;  %p285_p4 = scmp.lt.s32.totalorder %s279_s3, %s279_s3 }
  0x2c   :  { %v54_v6 = vadd.f32 %v53_v5, %v52_v4  ;;  %p286_p5 = por %p285_p4, %p284_p3 }
  0x2e   :  { %v55_v7 = vrot.slane %v54_v6, 2  ;;  %p287_p6 = pnand %p286_p5, %p280_p2 }
  0x30   :  { %v56_v8 = vadd.f32 %v55_v7, %v54_v6 }
  0x32   :  { %v57_v9 = vrot.slane %v56_v8, 1 }
  0x34   :  { %v58_v10 = vadd.f32 %v57_v9, %v56_v8 }
  0x36   :  { %v59_v11 = vadd.f32 1.0, %v58_v10 }
  0x38   :  { %233 = vrcp.f32 %v59_v11 }
  0x42   :  { %v234_v17 = vpop.eup %233 }
  0x43   :  { %v63_v18 = vmul.f32 %v234_v17, %v61_v15 }
  0x45   :  { %v69_v20 = vrot.slane %v63_v18, %v68_v16 }
  0x47   :  { %v71_v21 = vmul.f32 %v69_v20, %v64_v19 }
  0x49   :  { %80 = vxpose.xlu0.b32.start.end [1/1] (short) (narrow) %v71_v21, 16 }
  0xc9   :  { %v96_v23 = vpop.trf.xlu0 }
  0xca   :  { %224 = vmatprep.mubr.msk.f32.mxu0 %vm112_vm1, %v96_v23 }
  0xcd   :  { %v97_v24 = vpop.trf.xlu0 }
  0xce   :  { %225 = vmatmul.mubr.msk.f32.vlgmr.msra.gmra.mrb[0].mxu0 %vm112_vm1, %v97_v24 }
 0x1a1   :  { %v226_v26 = vpop.f32.mrb[0].mxu0 }
 0x1a2   :  { %v191_v27 = vadd.f32 %v226_v26, %v216_v25  ;;  %v185_v28 = vpop.f32.mrb[1].mxu0 }
 0x1a3   :  { %v186_v29 = vadd.f32 %v216_v25, %v185_v28 }
 0x1a4   :  { %v195_v30 = vmax.f32 %v191_v27, 0.0 }
 0x1a5   :  { %v194_v31 = vmax.f32 %v186_v29, 0.0 }
 0x1a6   :  { %197 = vst [vmem:[#allocation7 + $0x8] sm:$0xff] %v195_v30 }
 0x1a7   :  { %196 = vst [vmem:[#allocation7] sm:$0xff] %v194_v31 }
 0x1a8   :  { %290 = shalt.err (!%p287_p6)
}
 0x1a9   :  { %s291_s25 = scalar_lea.hbm %s398_s5, 256 }
 0x1aa   :  { %p292_p7 = scmp.ne.s32.totalorder %s398_s5, %s291_s25  ;;  %p295_p8 = scmp.lt.u32.totalorder %s291_s25, %s398_s5 }
 0x1ac   :  { %p297_p9 = pnand %p295_p8, %p292_p7 }
 0x1ae   :  { %300 = shalt.err (!%p297_p9)
}
 0x1af   :  { %209 = dma.vmem_to_hbm [thread:$0]  %s204_s23, 256, %s398_s5, [#allocation4], %s308_s28, %s308_s28, %s309_s29  }
 0x1b0   :  { %305 = dma.done.wait [#allocation4], 256  }
 0x1b1   :  { %306 = vsyncadd [#allocation4], 4294967040 }
 0x1b2   :  { %213 = vsyncpa [#allocation3], 1 }
 0x1b3   :  { %214 = vsyncpa [#allocation6], 1 }
 0x1b4   :  { %215 = vsyncpa [#allocation4], 1 }

</bundles_post_ra>
